<compile_context>
chip_gen: v7x
topology: tpu7x:2x2x1
jax: 0.10.0
libtpu: 0.0.40
codegen_flags: <defaults>
</compile_context>

<pallas_src>
import jax
import jax.numpy as jnp
import numpy as np
from jax import lax
from jax.experimental import pallas as pl
from jax.experimental.pallas import tpu as pltpu


def euler_kernel(x0_ref,      # VMEM (bb, D)
                 cond_t_ref,  # VMEM (T-1, bb, H)  = z@Wz + b1 + t[i-1], per step
                 w1_ref,      # VMEM (D, H)
                 dtw2_ref,    # VMEM (H, D)   = dt * W2
                 dtb2_ref,    # VMEM (1, D)   = dt * b2
                 out_ref):    # VMEM (T, bb, D) history
    T = out_ref.shape[0]

    # Hoisted, time-invariant loads / broadcasts (outside the unrolled loop;
    # JAX does not CSE broadcast_in_dim inside loops).
    w1 = w1_ref[...]
    dtw2 = dtw2_ref[...]
    dtb2 = jnp.broadcast_to(dtb2_ref[...], x0_ref.shape)   # (bb, D)

    x0 = x0_ref[...].astype(jnp.float32)
    out_ref[0] = x0.astype(out_ref.dtype)                  # x_history[0] = x0

    def step(i, x):
        # cond_t_ref[i-1] already contains z@Wz + b1 + t[i-1]  (f32).
        pre = jnp.dot(x.astype(w1.dtype), w1,
                      preferred_element_type=jnp.float32) + cond_t_ref[i - 1]
        h = jnp.tanh(pre)                                   # EUP
        x_new = x + jnp.dot(h.astype(dtw2.dtype), dtw2,
                            preferred_element_type=jnp.float32) + dtb2
        # post_fn is None -> identity
        out_ref[i] = x_new.astype(out_ref.dtype)            # x_history[i] = x
        return x_new

    lax.fori_loop(1, T, step, x0, unroll=True)


def forward_euler(x0, z, t, params, dt_scale, *, weights_dtype=jnp.float32):
    """Pallas ForwardEuler: returns x_history of shape (len(t), *x0.shape).

    weights_dtype=jnp.bfloat16 is an optional v6e/v7x throughput lever
    (do NOT use on v5e; loosen tolerances if enabled).
    """
    w1, b1, wz, w2, b2 = params
    B, D = x0.shape
    H = w1.shape[1]
    T = t.shape[0]

    # dt = (t[1] - t[0]) * self.dt, folded once into the output-layer weights.
    dt = (t[1] - t[0]).astype(jnp.float32) * dt_scale
    cond = (z.astype(jnp.float32) @ wz.astype(jnp.float32)
            + b1.astype(jnp.float32))                          # (B, H)
    # Fold the scalar time into the conditioning: (T-1, B, H), time-varying
    # but data-independent, so it is a plain pipelined VMEM input.
    cond_t = cond[None, :, :] + t[:-1].astype(jnp.float32)[:, None, None]
    w1_c = w1.astype(weights_dtype)
    dt_w2 = (dt * w2.astype(jnp.float32)).astype(weights_dtype)
    dt_b2 = (dt * b2.astype(jnp.float32)).astype(jnp.float32)  # (1, D)

    # Batch-block grid: split the batch across 2 blocks when it stays
    # lane-dense / sublane-aligned, so v7x's second TensorCore gets work
    # (harmless serial loop on v5e/v6e).  Otherwise a single grid point.
    num_blocks = 2 if (B % 16 == 0) else 1
    bb = B // num_blocks

    grid_spec = pltpu.PrefetchScalarGridSpec(
        num_scalar_prefetch=0,
        grid=(num_blocks,),
        in_specs=[
            pl.BlockSpec((bb, D), lambda b: (b, 0)),          # x0
            pl.BlockSpec((T - 1, bb, H), lambda b: (0, b, 0)),  # cond_t
            pl.BlockSpec((D, H), lambda b: (0, 0)),           # W1
            pl.BlockSpec((H, D), lambda b: (0, 0)),           # dt*W2
            pl.BlockSpec((1, D), lambda b: (0, 0)),           # dt*b2
        ],
        out_specs=pl.BlockSpec((T, bb, D), lambda b: (0, b, 0)),
    )
    # TODO(synk): for long horizons (T ~ thousands), add an "arbitrary" grid
    # axis over T-chunks with a VMEM (bb, D) state-carry scratch instead of
    # keeping the full history resident (earlier on v7x: 64 MiB VMEM).

    return pl.pallas_call(
        euler_kernel,
        out_shape=jax.ShapeDtypeStruct((T, B, D), x0.dtype),
        grid_spec=grid_spec,
        compiler_params=pltpu.CompilerParams(
            dimension_semantics=("parallel",)),
    )(x0, cond_t, w1_c, dt_w2, dt_b2)


def forward_euler_ref(x0, z, t, params, dt_scale):
    """Pure-JAX reference mirroring the PyTorch forward exactly."""
    w1, b1, wz, w2, b2 = params
    dt = (t[1] - t[0]) * dt_scale
    cond = z @ wz

    def ode_func(t_scalar, x):
        h = jnp.tanh(x @ w1 + cond + b1 + t_scalar)
        return h @ w2 + b2

    xs = [x0]
    x = x0
    for i in range(1, t.shape[0]):
        x = x + dt * ode_func(t[i - 1], x)
        xs.append(x)
    return jnp.stack(xs, axis=0)


if __name__ == "__main__":
    B, D, H, DZ, T = 16, 128, 128, 128, 8
    dt_scale = 0.1

    key = jax.random.PRNGKey(0)
    k0, k1, k2, k3, k4, k5, k6 = jax.random.split(key, 7)

    x0 = jax.random.normal(k0, (B, D), dtype=jnp.float32)
    z = jax.random.normal(k1, (B, DZ), dtype=jnp.float32)
    t = jnp.linspace(0.0, 1.0, T, dtype=jnp.float32)

    # deterministic synthetic parameters for the ode_func
    w1 = 0.05 * jax.random.normal(k2, (D, H), dtype=jnp.float32)
    b1 = 0.01 * jax.random.normal(k3, (1, H), dtype=jnp.float32)
    wz = 0.05 * jax.random.normal(k4, (DZ, H), dtype=jnp.float32)
    w2 = 0.05 * jax.random.normal(k5, (H, D), dtype=jnp.float32)
    b2 = 0.01 * jax.random.normal(k6, (1, D), dtype=jnp.float32)
    params = (w1, b1, wz, w2, b2)

    out = forward_euler(x0, z, t, params, dt_scale)
    out = jax.block_until_ready(out)

    ref = forward_euler_ref(x0, z, t, params, dt_scale)
    assert out.shape == (T, B, D), out.shape
    np.testing.assert_allclose(np.asarray(out), np.asarray(ref),
                               rtol=1e-4, atol=1e-4)
    print("KERNEL_OK")
</pallas_src>

<mosaic_0001>
module attributes {stable_mosaic.version = 11 : i64} {
  func.func @euler_kernel(%arg0: i32, %arg1: memref<8x128xf32, #tpu.memory_space<vmem>>, %arg2: memref<7x8x128xf32, #tpu.memory_space<vmem>>, %arg3: memref<128x128xf32, #tpu.memory_space<vmem>>, %arg4: memref<128x128xf32, #tpu.memory_space<vmem>>, %arg5: memref<1x128xf32, #tpu.memory_space<vmem>>, %arg6: memref<8x8x128xf32, #tpu.memory_space<vmem>>) attributes {dimension_semantics = [#tpu.dimension_semantics<parallel>], iteration_bounds = array<i64: 2>, scalar_prefetch = 0 : i64, scratch_operands = 0 : i64, tpu.core_type = #tpu.core_type<tc>, window_params = [{transform_indices = @transform_0, window_bounds = array<i64: 8, 128>}, {transform_indices = @transform_1, window_bounds = array<i64: 7, 8, 128>}, {pipeline_mode = #tpu.pipeline_mode<synchronous>, transform_indices = @transform_2, window_bounds = array<i64: 128, 128>}, {pipeline_mode = #tpu.pipeline_mode<synchronous>, transform_indices = @transform_3, window_bounds = array<i64: 128, 128>}, {pipeline_mode = #tpu.pipeline_mode<synchronous>, transform_indices = @transform_4, window_bounds = array<i64: 1, 128>}, {transform_indices = @transform_5, window_bounds = array<i64: 8, 8, 128>}]} {
    %c0 = arith.constant 0 : index
    %c0_0 = arith.constant 0 : index
    %0 = vector.load %arg3[%c0, %c0_0] : memref<128x128xf32, #tpu.memory_space<vmem>>, vector<128x128xf32>
    %c0_1 = arith.constant 0 : index
    %c0_2 = arith.constant 0 : index
    %1 = vector.load %arg4[%c0_1, %c0_2] : memref<128x128xf32, #tpu.memory_space<vmem>>, vector<128x128xf32>
    %c0_3 = arith.constant 0 : index
    %c0_4 = arith.constant 0 : index
    %2 = vector.load %arg5[%c0_3, %c0_4] : memref<1x128xf32, #tpu.memory_space<vmem>>, vector<1x128xf32>
    %3 = vector.shape_cast %2 : vector<1x128xf32> to vector<1x128xf32>
    %4 = vector.broadcast %3 : vector<1x128xf32> to vector<8x128xf32>
    %c0_5 = arith.constant 0 : index
    %c0_6 = arith.constant 0 : index
    %5 = vector.load %arg1[%c0_5, %c0_6] : memref<8x128xf32, #tpu.memory_space<vmem>>, vector<8x128xf32>
    %c0_7 = arith.constant 0 : index
    %c0_8 = arith.constant 0 : index
    %c0_9 = arith.constant 0 : index
    %6 = vector.load %arg6[%c0_7, %c0_8, %c0_9] : memref<8x8x128xf32, #tpu.memory_space<vmem>>, vector<1x8x128xf32>
    %7 = vector.shape_cast %6 : vector<1x8x128xf32> to vector<8x128xf32>
    %8 = vector.shape_cast %5 : vector<8x128xf32> to vector<1x8x128xf32>
    tpu.vector_store %arg6[%c0_7, %c0_8, %c0_9], %8 {strides = array<i32>} : memref<8x8x128xf32, #tpu.memory_space<vmem>>, vector<1x8x128xf32>,
    %c1_i32 = arith.constant 1 : i32
    %cst = arith.constant dense<0.000000e+00> : vector<8x128xf32>
    %9 = tpu.matmul %5, %0, %cst {dimension_numbers = #tpu.dot_dimension_numbers<[1], [0], [0], [1], [0, 0, 1, 1], [], []>} : vector<8x128xf32>, vector<128x128xf32>, vector<8x128xf32> -> vector<8x128xf32>
    %c1_i32_10 = arith.constant 1 : i32
    %10 = arith.subi %c1_i32, %c1_i32_10 : i32
    %11 = arith.index_cast %10 : i32 to index
    %c0_11 = arith.constant 0 : index
    %c0_12 = arith.constant 0 : index
    %12 = vector.load %arg2[%11, %c0_11, %c0_12] : memref<7x8x128xf32, #tpu.memory_space<vmem>>, vector<1x8x128xf32>
    %13 = vector.shape_cast %12 : vector<1x8x128xf32> to vector<8x128xf32>
    %14 = arith.addf %9, %13 : vector<8x128xf32>
    %15 = math.tanh %14 : vector<8x128xf32>
    %cst_13 = arith.constant dense<0.000000e+00> : vector<8x128xf32>
    %16 = tpu.matmul %15, %1, %cst_13 {dimension_numbers = #tpu.dot_dimension_numbers<[1], [0], [0], [1], [0, 0, 1, 1], [], []>} : vector<8x128xf32>, vector<128x128xf32>, vector<8x128xf32> -> vector<8x128xf32>
    %17 = arith.addf %5, %16 : vector<8x128xf32>
    %18 = arith.addf %17, %4 : vector<8x128xf32>
    %19 = arith.index_cast %c1_i32 : i32 to index
    %c0_14 = arith.constant 0 : index
    %c0_15 = arith.constant 0 : index
    %20 = vector.load %arg6[%19, %c0_14, %c0_15] : memref<8x8x128xf32, #tpu.memory_space<vmem>>, vector<1x8x128xf32>
    %21 = vector.shape_cast %20 : vector<1x8x128xf32> to vector<8x128xf32>
    %22 = vector.shape_cast %18 : vector<8x128xf32> to vector<1x8x128xf32>
    tpu.vector_store %arg6[%19, %c0_14, %c0_15], %22 {strides = array<i32>} : memref<8x8x128xf32, #tpu.memory_space<vmem>>, vector<1x8x128xf32>,
    %c2_i32 = arith.constant 2 : i32
    %cst_16 = arith.constant dense<0.000000e+00> : vector<8x128xf32>
    %23 = tpu.matmul %18, %0, %cst_16 {dimension_numbers = #tpu.dot_dimension_numbers<[1], [0], [0], [1], [0, 0, 1, 1], [], []>} : vector<8x128xf32>, vector<128x128xf32>, vector<8x128xf32> -> vector<8x128xf32>
    %c1_i32_17 = arith.constant 1 : i32
    %24 = arith.subi %c2_i32, %c1_i32_17 : i32
    %25 = arith.index_cast %24 : i32 to index
    %c0_18 = arith.constant 0 : index
    %c0_19 = arith.constant 0 : index
    %26 = vector.load %arg2[%25, %c0_18, %c0_19] : memref<7x8x128xf32, #tpu.memory_space<vmem>>, vector<1x8x128xf32>
    %27 = vector.shape_cast %26 : vector<1x8x128xf32> to vector<8x128xf32>
    %28 = arith.addf %23, %27 : vector<8x128xf32>
    %29 = math.tanh %28 : vector<8x128xf32>
    %cst_20 = arith.constant dense<0.000000e+00> : vector<8x128xf32>
    %30 = tpu.matmul %29, %1, %cst_20 {dimension_numbers = #tpu.dot_dimension_numbers<[1], [0], [0], [1], [0, 0, 1, 1], [], []>} : vector<8x128xf32>, vector<128x128xf32>, vector<8x128xf32> -> vector<8x128xf32>
    %31 = arith.addf %18, %30 : vector<8x128xf32>
    %32 = arith.addf %31, %4 : vector<8x128xf32>
    %33 = arith.index_cast %c2_i32 : i32 to index
    %c0_21 = arith.constant 0 : index
    %c0_22 = arith.constant 0 : index
    %34 = vector.load %arg6[%33, %c0_21, %c0_22] : memref<8x8x128xf32, #tpu.memory_space<vmem>>, vector<1x8x128xf32>
    %35 = vector.shape_cast %34 : vector<1x8x128xf32> to vector<8x128xf32>
    %36 = vector.shape_cast %32 : vector<8x128xf32> to vector<1x8x128xf32>
    tpu.vector_store %arg6[%33, %c0_21, %c0_22], %36 {strides = array<i32>} : memref<8x8x128xf32, #tpu.memory_space<vmem>>, vector<1x8x128xf32>,
    %c3_i32 = arith.constant 3 : i32
    %cst_23 = arith.constant dense<0.000000e+00> : vector<8x128xf32>
    %37 = tpu.matmul %32, %0, %cst_23 {dimension_numbers = #tpu.dot_dimension_numbers<[1], [0], [0], [1], [0, 0, 1, 1], [], []>} : vector<8x128xf32>, vector<128x128xf32>, vector<8x128xf32> -> vector<8x128xf32>
    %c1_i32_24 = arith.constant 1 : i32
    %38 = arith.subi %c3_i32, %c1_i32_24 : i32
    %39 = arith.index_cast %38 : i32 to index
    %c0_25 = arith.constant 0 : index
    %c0_26 = arith.constant 0 : index
    %40 = vector.load %arg2[%39, %c0_25, %c0_26] : memref<7x8x128xf32, #tpu.memory_space<vmem>>, vector<1x8x128xf32>
    %41 = vector.shape_cast %40 : vector<1x8x128xf32> to vector<8x128xf32>
    %42 = arith.addf %37, %41 : vector<8x128xf32>
    %43 = math.tanh %42 : vector<8x128xf32>
    %cst_27 = arith.constant dense<0.000000e+00> : vector<8x128xf32>
    %44 = tpu.matmul %43, %1, %cst_27 {dimension_numbers = #tpu.dot_dimension_numbers<[1], [0], [0], [1], [0, 0, 1, 1], [], []>} : vector<8x128xf32>, vector<128x128xf32>, vector<8x128xf32> -> vector<8x128xf32>
    %45 = arith.addf %32, %44 : vector<8x128xf32>
    %46 = arith.addf %45, %4 : vector<8x128xf32>
    %47 = arith.index_cast %c3_i32 : i32 to index
    %c0_28 = arith.constant 0 : index
    %c0_29 = arith.constant 0 : index
    %48 = vector.load %arg6[%47, %c0_28, %c0_29] : memref<8x8x128xf32, #tpu.memory_space<vmem>>, vector<1x8x128xf32>
    %49 = vector.shape_cast %48 : vector<1x8x128xf32> to vector<8x128xf32>
    %50 = vector.shape_cast %46 : vector<8x128xf32> to vector<1x8x128xf32>
    tpu.vector_store %arg6[%47, %c0_28, %c0_29], %50 {strides = array<i32>} : memref<8x8x128xf32, #tpu.memory_space<vmem>>, vector<1x8x128xf32>,
    %c4_i32 = arith.constant 4 : i32
    %cst_30 = arith.constant dense<0.000000e+00> : vector<8x128xf32>
    %51 = tpu.matmul %46, %0, %cst_30 {dimension_numbers = #tpu.dot_dimension_numbers<[1], [0], [0], [1], [0, 0, 1, 1], [], []>} : vector<8x128xf32>, vector<128x128xf32>, vector<8x128xf32> -> vector<8x128xf32>
    %c1_i32_31 = arith.constant 1 : i32
    %52 = arith.subi %c4_i32, %c1_i32_31 : i32
    %53 = arith.index_cast %52 : i32 to index
    %c0_32 = arith.constant 0 : index
    %c0_33 = arith.constant 0 : index
    %54 = vector.load %arg2[%53, %c0_32, %c0_33] : memref<7x8x128xf32, #tpu.memory_space<vmem>>, vector<1x8x128xf32>
    %55 = vector.shape_cast %54 : vector<1x8x128xf32> to vector<8x128xf32>
    %56 = arith.addf %51, %55 : vector<8x128xf32>
    %57 = math.tanh %56 : vector<8x128xf32>
    %cst_34 = arith.constant dense<0.000000e+00> : vector<8x128xf32>
    %58 = tpu.matmul %57, %1, %cst_34 {dimension_numbers = #tpu.dot_dimension_numbers<[1], [0], [0], [1], [0, 0, 1, 1], [], []>} : vector<8x128xf32>, vector<128x128xf32>, vector<8x128xf32> -> vector<8x128xf32>
    %59 = arith.addf %46, %58 : vector<8x128xf32>
    %60 = arith.addf %59, %4 : vector<8x128xf32>
    %61 = arith.index_cast %c4_i32 : i32 to index
    %c0_35 = arith.constant 0 : index
    %c0_36 = arith.constant 0 : index
    %62 = vector.load %arg6[%61, %c0_35, %c0_36] : memref<8x8x128xf32, #tpu.memory_space<vmem>>, vector<1x8x128xf32>
    %63 = vector.shape_cast %62 : vector<1x8x128xf32> to vector<8x128xf32>
    %64 = vector.shape_cast %60 : vector<8x128xf32> to vector<1x8x128xf32>
    tpu.vector_store %arg6[%61, %c0_35, %c0_36], %64 {strides = array<i32>} : memref<8x8x128xf32, #tpu.memory_space<vmem>>, vector<1x8x128xf32>,
    %c5_i32 = arith.constant 5 : i32
    %cst_37 = arith.constant dense<0.000000e+00> : vector<8x128xf32>
    %65 = tpu.matmul %60, %0, %cst_37 {dimension_numbers = #tpu.dot_dimension_numbers<[1], [0], [0], [1], [0, 0, 1, 1], [], []>} : vector<8x128xf32>, vector<128x128xf32>, vector<8x128xf32> -> vector<8x128xf32>
    %c1_i32_38 = arith.constant 1 : i32
    %66 = arith.subi %c5_i32, %c1_i32_38 : i32
    %67 = arith.index_cast %66 : i32 to index
    %c0_39 = arith.constant 0 : index
    %c0_40 = arith.constant 0 : index
    %68 = vector.load %arg2[%67, %c0_39, %c0_40] : memref<7x8x128xf32, #tpu.memory_space<vmem>>, vector<1x8x128xf32>
    %69 = vector.shape_cast %68 : vector<1x8x128xf32> to vector<8x128xf32>
    %70 = arith.addf %65, %69 : vector<8x128xf32>
    %71 = math.tanh %70 : vector<8x128xf32>
    %cst_41 = arith.constant dense<0.000000e+00> : vector<8x128xf32>
    %72 = tpu.matmul %71, %1, %cst_41 {dimension_numbers = #tpu.dot_dimension_numbers<[1], [0], [0], [1], [0, 0, 1, 1], [], []>} : vector<8x128xf32>, vector<128x128xf32>, vector<8x128xf32> -> vector<8x128xf32>
    %73 = arith.addf %60, %72 : vector<8x128xf32>
    %74 = arith.addf %73, %4 : vector<8x128xf32>
    %75 = arith.index_cast %c5_i32 : i32 to index
    %c0_42 = arith.constant 0 : index
    %c0_43 = arith.constant 0 : index
    %76 = vector.load %arg6[%75, %c0_42, %c0_43] : memref<8x8x128xf32, #tpu.memory_space<vmem>>, vector<1x8x128xf32>
    %77 = vector.shape_cast %76 : vector<1x8x128xf32> to vector<8x128xf32>
    %78 = vector.shape_cast %74 : vector<8x128xf32> to vector<1x8x128xf32>
    tpu.vector_store %arg6[%75, %c0_42, %c0_43], %78 {strides = array<i32>} : memref<8x8x128xf32, #tpu.memory_space<vmem>>, vector<1x8x128xf32>,
    %c6_i32 = arith.constant 6 : i32
    %cst_44 = arith.constant dense<0.000000e+00> : vector<8x128xf32>
    %79 = tpu.matmul %74, %0, %cst_44 {dimension_numbers = #tpu.dot_dimension_numbers<[1], [0], [0], [1], [0, 0, 1, 1], [], []>} : vector<8x128xf32>, vector<128x128xf32>, vector<8x128xf32> -> vector<8x128xf32>
    %c1_i32_45 = arith.constant 1 : i32
    %80 = arith.subi %c6_i32, %c1_i32_45 : i32
    %81 = arith.index_cast %80 : i32 to index
    %c0_46 = arith.constant 0 : index
    %c0_47 = arith.constant 0 : index
    %82 = vector.load %arg2[%81, %c0_46, %c0_47] : memref<7x8x128xf32, #tpu.memory_space<vmem>>, vector<1x8x128xf32>
    %83 = vector.shape_cast %82 : vector<1x8x128xf32> to vector<8x128xf32>
    %84 = arith.addf %79, %83 : vector<8x128xf32>
    %85 = math.tanh %84 : vector<8x128xf32>
    %cst_48 = arith.constant dense<0.000000e+00> : vector<8x128xf32>
    %86 = tpu.matmul %85, %1, %cst_48 {dimension_numbers = #tpu.dot_dimension_numbers<[1], [0], [0], [1], [0, 0, 1, 1], [], []>} : vector<8x128xf32>, vector<128x128xf32>, vector<8x128xf32> -> vector<8x128xf32>
    %87 = arith.addf %74, %86 : vector<8x128xf32>
    %88 = arith.addf %87, %4 : vector<8x128xf32>
    %89 = arith.index_cast %c6_i32 : i32 to index
    %c0_49 = arith.constant 0 : index
    %c0_50 = arith.constant 0 : index
    %90 = vector.load %arg6[%89, %c0_49, %c0_50] : memref<8x8x128xf32, #tpu.memory_space<vmem>>, vector<1x8x128xf32>
    %91 = vector.shape_cast %90 : vector<1x8x128xf32> to vector<8x128xf32>
    %92 = vector.shape_cast %88 : vector<8x128xf32> to vector<1x8x128xf32>
    tpu.vector_store %arg6[%89, %c0_49, %c0_50], %92 {strides = array<i32>} : memref<8x8x128xf32, #tpu.memory_space<vmem>>, vector<1x8x128xf32>,
    %c7_i32 = arith.constant 7 : i32
    %cst_51 = arith.constant dense<0.000000e+00> : vector<8x128xf32>
    %93 = tpu.matmul %88, %0, %cst_51 {dimension_numbers = #tpu.dot_dimension_numbers<[1], [0], [0], [1], [0, 0, 1, 1], [], []>} : vector<8x128xf32>, vector<128x128xf32>, vector<8x128xf32> -> vector<8x128xf32>
    %c1_i32_52 = arith.constant 1 : i32
    %94 = arith.subi %c7_i32, %c1_i32_52 : i32
    %95 = arith.index_cast %94 : i32 to index
    %c0_53 = arith.constant 0 : index
    %c0_54 = arith.constant 0 : index
    %96 = vector.load %arg2[%95, %c0_53, %c0_54] : memref<7x8x128xf32, #tpu.memory_space<vmem>>, vector<1x8x128xf32>
    %97 = vector.shape_cast %96 : vector<1x8x128xf32> to vector<8x128xf32>
    %98 = arith.addf %93, %97 : vector<8x128xf32>
    %99 = math.tanh %98 : vector<8x128xf32>
    %cst_55 = arith.constant dense<0.000000e+00> : vector<8x128xf32>
    %100 = tpu.matmul %99, %1, %cst_55 {dimension_numbers = #tpu.dot_dimension_numbers<[1], [0], [0], [1], [0, 0, 1, 1], [], []>} : vector<8x128xf32>, vector<128x128xf32>, vector<8x128xf32> -> vector<8x128xf32>
    %101 = arith.addf %88, %100 : vector<8x128xf32>
    %102 = arith.addf %101, %4 : vector<8x128xf32>
    %103 = arith.index_cast %c7_i32 : i32 to index
    %c0_56 = arith.constant 0 : index
    %c0_57 = arith.constant 0 : index
    %104 = vector.load %arg6[%103, %c0_56, %c0_57] : memref<8x8x128xf32, #tpu.memory_space<vmem>>, vector<1x8x128xf32>
    %105 = vector.shape_cast %104 : vector<1x8x128xf32> to vector<8x128xf32>
    %106 = vector.shape_cast %102 : vector<8x128xf32> to vector<1x8x128xf32>
    tpu.vector_store %arg6[%103, %c0_56, %c0_57], %106 {strides = array<i32>} : memref<8x8x128xf32, #tpu.memory_space<vmem>>, vector<1x8x128xf32>,
    %c7_i32_58 = arith.constant 7 : i32
    return
  }
  func.func @transform_0(%arg0: i32) -> (i32, i32) {
    %c0_i32 = arith.constant 0 : i32
    %c0_i32_0 = arith.constant 0 : i32
    return %arg0, %c0_i32 : i32, i32
  }
  func.func @transform_1(%arg0: i32) -> (i32, i32, i32) {
    %c0_i32 = arith.constant 0 : i32
    %c0_i32_0 = arith.constant 0 : i32
    %c0_i32_1 = arith.constant 0 : i32
    return %c0_i32, %arg0, %c0_i32_0 : i32, i32, i32
  }
  func.func @transform_2(%arg0: i32) -> (i32, i32) {
    %c0_i32 = arith.constant 0 : i32
    %c0_i32_0 = arith.constant 0 : i32
    %c0_i32_1 = arith.constant 0 : i32
    return %c0_i32, %c0_i32_0 : i32, i32
  }
  func.func @transform_3(%arg0: i32) -> (i32, i32) {
    %c0_i32 = arith.constant 0 : i32
    %c0_i32_0 = arith.constant 0 : i32
    %c0_i32_1 = arith.constant 0 : i32
    return %c0_i32, %c0_i32_0 : i32, i32
  }
  func.func @transform_4(%arg0: i32) -> (i32, i32) {
    %c0_i32 = arith.constant 0 : i32
    %c0_i32_0 = arith.constant 0 : i32
    %c0_i32_1 = arith.constant 0 : i32
    return %c0_i32, %c0_i32_0 : i32, i32
  }
  func.func @transform_5(%arg0: i32) -> (i32, i32, i32) {
    %c0_i32 = arith.constant 0 : i32
    %c0_i32_0 = arith.constant 0 : i32
    %c0_i32_1 = arith.constant 0 : i32
    return %c0_i32, %arg0, %c0_i32_0 : i32, i32, i32
  }
}

</mosaic_0001>

<bundles_post_ra>
// kernel: tpu_custom_call.1
= control target key start
LH: loop header
LB: loop body
LE: loop exit
PB: predicated region body
PF: predicated region fallthrough
CT: control target
= control target key end

     0   :  { %s3554_s0 = inlined_call_operand.hbm [shape: f32[16,128], index: 0, kind: input, shape index: {}]   ;;  %s3555_s1 = inlined_call_operand.hbm [shape: f32[7,16,128], index: 1, kind: input, shape index: {}]   ;;  %s3556_s2 = inlined_call_operand.hbm [shape: f32[128,128], index: 2, kind: input, shape index: {}]   ;;  %s3557_s3 = inlined_call_operand.hbm [shape: f32[128,128], index: 3, kind: input, shape index: {}]   ;;  %s3558_s4 = inlined_call_operand.vmem [shape: f32[1,128], index: 4, kind: input, shape index: {}]   ;;  %s3559_s5 = inlined_call_operand.hbm [shape: f32[8,16,128], index: 5, kind: output, shape index: {}]  }
   0x1   :  { %3565 = sst [smem:[#allocation16_spill]] %s3556_s2 }
   0x2   :  { %3566 = sst [smem:[#allocation17_spill]] %s3557_s3 }
   0x3   :  { %10 = vsyncpa [#allocation3], 0 }
   0x4   :  { %12 = vsyncpa [#allocation3 + $0x1], 0 }
   0x5   :  { %13 = vsyncpa [#allocation6], 0 }
   0x6   :  { %15 = vsyncpa [#allocation6 + $0x1], 0 }
   0x7   :  { %16 = vsyncpa [#allocation9], 0 }
   0x8   :  { %17 = vsyncpa [#allocation4], 0 }
   0x9   :  { %19 = vsyncpa [#allocation4 + $0x1], 0  ;;  %s2937_s18 = smov 0   ;;  %s2939_s19 = smov 0  }
   0xa   :  { %s2941_s20 = smov 0   ;;  %s2943_s21 = smov 0  }
   0xb LB: > { %s2958_s22 = sadd.s32 4294967295, %s2891_s21   ;;  %s1505_s23 = sadd.s32 4294967294, %s2891_s21   ;;  %s2891_s21 = sphi %s2943_s21, %s3590_s21   ;;  %s2887_s20 = sphi %s2941_s20, %s3589_s20   ;;  %s2883_s19 = sphi %s2939_s19, %s3588_s19   ;;  %s2879_s18 = sphi %s2937_s18, %s3587_s18  }
   0xc   : > { %p45_p0 = scmp.ne.s32.totalorder %s2883_s19, %s2879_s18  ;;  %p3560_p1 = scmp.eq.s32.totalorder %s2958_s22, 0 }
   0xd   : > { %p164_p3 = scmp.eq.s32.totalorder %s1505_s23, 1  ;;  %p1506_p5 = scmp.ge.s32.totalorder %s2891_s21, 1 }
   0xe   : > { %p2967_p4 = por %p3560_p1, %p45_p0  ;;  %p171_p7 = scmp.lt.s32.totalorder %s2891_s21, 3 }
   0xf   : > { %p2972_p6 = por %p164_p3, %p45_p0  ;;  %s2893_s27 = smov [#allocation7]  }
  0x10   : > { %s3567_s24 = scalar_select %p2967_p4, 1, 0 }
  0x11   : > { %s3568_s25 = scalar_select %p2972_p6, 1, 0 }
  0x12   : > { %p2977_p8 = pnand %p1506_p5, %p171_p7  ;;  %s183_s28 = sshll.u32 %s2893_s27, 4  ;;  %s2981_s28 = int_to_ptr.vmem [resolvable:$true] %s183_s28 }
  0x13   : > { %s2894_s30 = smov [#allocation8]   ;;  %s3571_s2 = sld [smem:[#allocation16_spill]] }
  0x14   : > { %p2616_p9 = pneg %p2977_p8  ;;  %s196_s6 = sshll.u32 %s2894_s30, 4  ;;  %s2992_s6 = int_to_ptr.vmem [resolvable:$true] %s196_s6 }
  0x16   : > { %p2988_p11 = pnand %p2616_p9, %p3560_p1 }
  0x18   : > { %p2699_p13 = pneg %p2988_p11 }
  0x19   : > { %s2697_s9 = scalar_lea.hbm %s3571_s2, 2048 }
  0x1a   : > { %p2698_p12 = scmp.ne.s32.totalorder %s3571_s2, %s2697_s9  ;;  %p2704_p5 = scmp.lt.u32.totalorder %s2697_s9, %s3571_s2 }
  0x1c   : > { %p2700_p0 = pnand %p2699_p13, %p2698_p12 }
  0x1e   : > { %p2701_p3 = pneg %p2700_p0 }
  0x20   : > { %p2706_p7 = pnand %p2704_p5, %p2701_p3 }
  0x22   : > { %2709 = shalt.err (!%p2706_p7)
}
  0x23   : > { %s2710_s14 = scalar_lea.vmem %s2981_s28, 2048  ;;  %p2718_p2 = scmp.lt.s32.totalorder %s2981_s28, %s2981_s28 }
  0x24   : > { %p2711_p9 = scmp.ne.s32.totalorder %s2981_s28, %s2710_s14  ;;  %p2719_p12 = scmp.lt.s32.totalorder %s2710_s14, %s2710_s14 }
  0x26   : > { %p2713_p10 = pnand %p2711_p9, %p2699_p13  ;;  %p2720_p0 = por %p2719_p12, %p2718_p2 }
  0x28   : > { %p2714_p1 = pneg %p2713_p10 }
  0x2a   : > { %p2721_p6 = pnand %p2720_p0, %p2714_p1 }
  0x2c   : > { %2724 = shalt.err (!%p2721_p6)
}
  0x2d   : > { %s3561_s15 = smov 128   ;;  %s3562_s16 = smov 8  }
  0x2e   : > { %2619 = dma.hbm_to_vmem [thread:$0]  (!%p2988_p11), %s3571_s2, 2048, %s2981_s28, [#allocation6], %s3561_s15, %s3561_s15, %s3562_s16  }
  0x2f   : > { %s3572_s3 = sld [smem:[#allocation17_spill]] }
  0x35   : > { %s2725_s7 = scalar_lea.hbm %s3572_s3, 2048 }
  0x36   : > { %p2726_p1 = scmp.ne.s32.totalorder %s3572_s3, %s2725_s7  ;;  %p2732_p10 = scmp.lt.u32.totalorder %s2725_s7, %s3572_s3 }
  0x38   : > { %p2728_p2 = pnand %p2726_p1, %p2699_p13 }
  0x3a   : > { %p2729_p6 = pneg %p2728_p2 }
  0x3c   : > { %p2734_p3 = pnand %p2732_p10, %p2729_p6 }
  0x3e   : > { %2737 = shalt.err (!%p2734_p3)
}
  0x3f   : > { %s2738_s28 = scalar_lea.vmem %s2992_s6, 2048  ;;  %p2746_p12 = scmp.lt.s32.totalorder %s2992_s6, %s2992_s6 }
  0x40   : > { %p2739_p5 = scmp.ne.s32.totalorder %s2992_s6, %s2738_s28  ;;  %p2747_p0 = scmp.lt.s32.totalorder %s2738_s28, %s2738_s28 }
  0x42   : > { %p2741_p7 = pnand %p2739_p5, %p2699_p13  ;;  %p2748_p1 = por %p2747_p0, %p2746_p12 }
  0x44   : > { %p2742_p9 = pneg %p2741_p7 }
  0x46   : > { %p2749_p2 = pnand %p2748_p1, %p2742_p9 }
  0x48   : > { %2752 = shalt.err (!%p2749_p2)
}
  0x49   : > { %2622 = dma.hbm_to_vmem [thread:$0]  (!%p2988_p11), %s3572_s3, 2048, %s2992_s6, [#allocation9], %s3561_s15, %s3561_s15, %s3562_s16  }
  0x4a   : > { %s3053_s29 = sadd.s32 1, %s2891_s21   ;;  %s32_s14 = sadd.s32 1, %s2887_s20 }
  0x4b   : > { %s29_s17 = ssub.s32 %s2891_s21, %s3053_s29  ;;  %p39_p13 = scmp.ne.s32.totalorder %s2887_s20, %s2883_s19 }
  0x4c   : > { %p30_p6 = scmp.eq.s32.totalorder %s29_s17, 0  ;;  %p40_p10 = scmp.eq.s32.totalorder %s2891_s21, 0 }
  0x4d   : > { %p3573_p3 = scmp.eq.s32.totalorder %s2958_s22, 1  ;;  %p2636_p7 = scmp.lt.s32.totalorder %s2891_s21, 2 }
  0x4e   : > { %s3069_s27 = scalar_select %p30_p6, %s2887_s20, %s32_s14  }
  0x4f   : > { %p3063_p5 = por %p3573_p3, %p39_p13  ;;  %p41_p9 = por %p40_p10, %p39_p13 }
  0x50   : > { %s3072_s30 = sand.u32 1, %s2887_s20   ;;  %s1511_s7 = sshll.u32 %s2891_s21, 7 }
  0x51   : > { %s3574_s23 = scalar_select %p3063_p5, 1, 0 }
  0x52   : > { %s1510_s6 = sshll.u32 %s3072_s30, 3  ;;  %s3079_s10 = scalar_lea.hbm %s3554_s0, %s1511_s7 }
  0x53   : > { %s217_s11 = scalar_lea.vmem [#allocation2], %s1510_s6  ;;  %p3083_p11 = pnand %p2636_p7, %p41_p9 }
  0x54   : > { %s224_s28 = sshll.u32 %s217_s11, 4  ;;  %s3091_s8 = scalar_lea.hbm %s3555_s1, %s1511_s7  ;;  %s3081_s28 = int_to_ptr.vmem [resolvable:$true] %s224_s28 }
  0x55   : > { %s231_s9 = sand.u32 1, %s2891_s21   ;;  %s214_s15 = scalar_lea.sflag [#allocation3], %s3072_s30 }
  0x56   : > { %s2753_s16 = scalar_lea.hbm %s3079_s10, 128  ;;  %p2755_p0 = pneg %p3083_p11 }
  0x57   : > { %p2754_p12 = scmp.ne.s32.totalorder %s3079_s10, %s2753_s16  ;;  %s2758_s2 = scalar_lea.hbm %s3554_s0, 256 }
  0x58   : > { %p2759_p13 = scmp.lt.u32.totalorder %s3079_s10, %s3554_s0  ;;  %p2760_p6 = scmp.lt.u32.totalorder %s2758_s2, %s2753_s16 }
  0x59   : > { %p2756_p1 = pnand %p2755_p0, %p2754_p12  ;;  %p2762_p3 = scmp.lt.u32.totalorder %s2753_s16, %s3079_s10 }
  0x5a   : > { %p2761_p10 = por %p2760_p6, %p2759_p13 }
  0x5b   : > { %p2757_p2 = pneg %p2756_p1 }
  0x5c   : > { %p2763_p7 = por %p2762_p3, %p2761_p10 }
  0x5e   : > { %p2764_p9 = pnand %p2763_p7, %p2757_p2 }
  0x60   : > { %2767 = shalt.err (!%p2764_p9)
}
  0x61   : > { %s2768_s7 = scalar_lea.vmem %s3081_s28, 128  ;;  %s2897_s14 = smov [#allocation2]  }
  0x62   : > { %p2769_p12 = scmp.ne.s32.totalorder %s3081_s28, %s2768_s7  ;;  %s2773_s17 = sshll.u32 %s2897_s14, 4  ;;  %s2774_s17 = int_to_ptr.vmem [resolvable:$false] %s2773_s17 }
  0x63   : > { %s2775_s3 = scalar_lea.vmem %s2774_s17, 256  ;;  %p2776_p4 = scmp.lt.s32.totalorder %s3081_s28, %s2774_s17 }
  0x64   : > { %p2771_p1 = pnand %p2769_p12, %p2755_p0  ;;  %p2777_p13 = scmp.lt.s32.totalorder %s2775_s3, %s2768_s7 }
  0x66   : > { %p2772_p5 = pneg %p2771_p1  ;;  %p2778_p6 = por %p2777_p13, %p2776_p4 }
  0x68   : > { %p2779_p10 = pnand %p2778_p6, %p2772_p5 }
  0x6a   : > { %2782 = shalt.err (!%p2779_p10)
}
  0x6b   : > { %2626 = dma.hbm_to_vmem [thread:$0]  (!%p3083_p11), %s3079_s10, 128, %s3081_s28, %s214_s15  }
  0x6c   : > { %s3576_s2 = smul.u32 56, %s3072_s30  ;;  %s3126_s6 = scalar_lea.sflag [#allocation6], %s231_s9 }
  0x6d   : > { %s2783_s11 = scalar_lea.hbm %s3091_s8, 896  ;;  %s2788_s17 = scalar_lea.hbm %s3555_s1, 1792 }
  0x6e   : > { %s235_s16 = scalar_lea.vmem [#allocation5], %s3576_s2  ;;  %p2784_p4 = scmp.ne.s32.totalorder %s3091_s8, %s2783_s11 }
  0x6f   : > { %s241_s13 = sshll.u32 %s235_s16, 4  ;;  %p2789_p3 = scmp.lt.u32.totalorder %s3091_s8, %s3555_s1  ;;  %s3122_s13 = int_to_ptr.vmem [resolvable:$true] %s241_s13 }
  0x70   : > { %p2786_p5 = pnand %p2784_p4, %p2755_p0  ;;  %p2790_p7 = scmp.lt.u32.totalorder %s2788_s17, %s2783_s11 }
  0x71   : > { %p2792_p12 = scmp.lt.u32.totalorder %s2783_s11, %s3091_s8 }
  0x72   : > { %p2787_p2 = pneg %p2786_p5  ;;  %p2791_p9 = por %p2790_p7, %p2789_p3 }
  0x74   : > { %p2793_p1 = por %p2792_p12, %p2791_p9 }
  0x76   : > { %p2794_p13 = pnand %p2793_p1, %p2787_p2 }
  0x78   : > { %2797 = shalt.err (!%p2794_p13)
}
  0x79   : > { %s2798_s30 = scalar_lea.vmem %s3122_s13, 896  ;;  %s2898_s10 = smov [#allocation5]  }
  0x7a   : > { %p2799_p6 = scmp.ne.s32.totalorder %s3122_s13, %s2798_s30  ;;  %s2803_s28 = sshll.u32 %s2898_s10, 4  ;;  %s2804_s28 = int_to_ptr.vmem [resolvable:$false] %s2803_s28 }
  0x7b   : > { %s2805_s9 = scalar_lea.vmem %s2804_s28, 1792  ;;  %p2806_p5 = scmp.lt.s32.totalorder %s3122_s13, %s2804_s28 }
  0x7c   : > { %p2801_p10 = pnand %p2799_p6, %p2755_p0  ;;  %p2807_p3 = scmp.lt.s32.totalorder %s2805_s9, %s2798_s30 }
  0x7e   : > { %p2802_p4 = pneg %p2801_p10  ;;  %p2808_p7 = por %p2807_p3, %p2806_p5 }
  0x80   : > { %p2809_p9 = pnand %p2808_p7, %p2802_p4 }
  0x82   : > { %2812 = shalt.err (!%p2809_p9)
}
  0x83   : > { %s2899_s2 = smov 256   ;;  %s3577_s16 = smov 8  }
  0x84   : > { %s3578_s11 = smov 128   ;;  %253 = sbr.rel (%p2977_p8) target bundleno = 3287 (0xcd7), region = 40 }
  0x85   : > { %2629 = dma.hbm_to_vmem [thread:$0]  (!%p3083_p11), %s3091_s8, 896, %s3122_s13, %s3126_s6, %s2899_s2, %s3578_s11, %s3577_s16  }
  0x86   : > { %s3157_s7 = sand.u32 (!%p2977_p8), 1, %s2883_s19   ;;  %p3579_p0 = scmp.ne.s32.totalorder (!%p2977_p8), %s3567_s24, 0 }
  0x87   : > { %s1514_s14 = sshll.u32 (!%p2977_p8), %s3157_s7, 3  ;;  %s256_s17 = scalar_lea.sflag (!%p2977_p8), [#allocation3], %s3157_s7 }
  0x88   : > { %s3161_s3 = scalar_lea.vmem (!%p2977_p8), [#allocation2], %s1514_s14 }
  0x8b   : > { %2858 = dma.done.wait (%p3579_p0), %s256_s17, 128  }
  0x8c   : > { %2860 = vsyncadd (%p3579_p0), %s256_s17, 4294967168  ;;  %s264_s26 = sand.u32 1, %s2958_s22   ;;  %s2601_s12 = smul.u32 56, %s3157_s7 }
  0x8d   : > { %s265_s8 = scalar_lea.sflag [#allocation6], %s264_s26 }
  0x8e   : > { %s3169_s13 = scalar_lea.vmem [#allocation5], %s2601_s12 }
  0x8f   : > { %2862 = dma.done.wait (%p3579_p0), %s265_s8, 896  }
  0x90   : > { %2864 = vsyncadd (%p3579_p0), %s265_s8, 4294966400  ;;  %p3580_p8 = scmp.eq.s32.totalorder %s2958_s22, 0 }
  0x92   : > { %2866 = dma.done.wait (%p3580_p8), [#allocation6], 2048   ;;  %p3581_p11 = pmov %p3580_p8 }
  0x93   : > { %p3582_p2 = pmov %p3580_p8 }
  0x94   : > { %2868 = vsyncadd (%p3581_p11), [#allocation6], 4294965248 }
  0x95   : > { %2870 = dma.done.wait (%p3582_p2), [#allocation9], 2048   ;;  %p3583_p12 = pmov %p3582_p2 }
  0x96   : > { %v2900_v0 = vmov 0.0|0.0   ;;  %vm2901_vm0 = vmmov 0   ;;  %v2902_v1 = vmov 0.0   ;;  %v308_v2 = vld [vmem:[#allocation7] sm:$0xff]  ;;  %v309_v3 = vld [vmem:[#allocation7 + $0x8] sm:$0xff]  ;;  %v310_v4 = vld [vmem:[#allocation7 + $0x10] sm:$0xff] }
  0x97   : > { %2872 = vsyncadd (%p3583_p12), [#allocation9], 4294965248  ;;  %2264 = vmatprep.subr.bf16.mxu0 %v2900_v0  ;;  %1806 = vmatprep.mubr.msk.f32.mxu0 %vm2901_vm0, %v2902_v1  ;;  %v3189_v5 = vpack.c.bf16 %v309_v3, %v308_v2  ;;  %v311_v6 = vld [vmem:[#allocation7 + $0x18] sm:$0xff]  ;;  %s1517_s24 = sshll.u32 %s3157_s7, 6  ;;  %v312_v8 = vld [vmem:[#allocation7 + $0x20] sm:$0xff]  ;;  %s1533_s28 = sshll.u32 %s2958_s22, 7 }
  0x98   : > { %2288 = vmatprep.subr.bf16.mxu1 %v2900_v0  ;;  %1841 = vmatprep.mubr.msk.f32.mxu1 %vm2901_vm0, %v2902_v1  ;;  %v3193_v7 = vpack.c.bf16 %v311_v6, %v310_v4  ;;  %v313_v9 = vld [vmem:[#allocation7 + $0x28] sm:$0xff]  ;;  %v324_v11 = vld [vmem:[#allocation8] sm:$0xff]  ;;  %s3199_s6 = scalar_lea.vmem [#allocation10], %s1517_s24  ;;  %v326_v13 = vld [vmem:[#allocation8 + $0x10] sm:$0xff]  ;;  %s3508_s16 = scalar_lea.hbm %s3559_s5, %s1533_s28 }
  0x99   : > { %2266 = vmatpush3.bf16.msra.mxu0 %v3189_v5  ;;  %v3197_v10 = vld [vmem:[%s3161_s3] sm:$0xff]  ;;  %v327_v14 = vld [vmem:[#allocation8 + $0x18] sm:$0xff]  ;;  %v3204_v15 = vpack.c.bf16 %v313_v9, %v312_v8  ;;  %v314_v17 = vld [vmem:[#allocation7 + $0x30] sm:$0xff]  ;;  %s1390_s10 = sshll.u32 %s3199_s6, 4  ;;  %s1378_s11 = scalar_lea.sflag [#allocation4], %s3157_s7  ;;  %s3503_s10 = int_to_ptr.vmem [resolvable:$true] %s1390_s10 }
  0x9a   : > { %2267 = vmatprep.subr.bf16.mxu0 %v2900_v0  ;;  %348 = vst [vmem:[%s3199_s6] sm:$0xff] %v3197_v10  ;;  %v325_v12 = vld [vmem:[#allocation8 + $0x8] sm:$0xff]  ;;  %v315_v18 = vld [vmem:[#allocation7 + $0x38] sm:$0xff]  ;;  %v3210_v19 = vpack.c.bf16 %v327_v14, %v326_v13  ;;  %v328_v20 = vld [vmem:[#allocation8 + $0x20] sm:$0xff]  ;;  %s2813_s14 = scalar_lea.vmem %s3503_s10, 1024  ;;  %p3584_p13 = scmp.ne.s32.totalorder %s3574_s23, 0 }
  0x9b   : > { %v3206_v16 = vpack.c.bf16 %v325_v12, %v324_v11  ;;  %v329_v21 = vld [vmem:[#allocation8 + $0x28] sm:$0xff]  ;;  %v3214_v22 = vpack.c.bf16 %v315_v18, %v314_v17  ;;  %v316_v23 = vld [vmem:[#allocation7 + $0x40] sm:$0xff]  ;;  %v330_v26 = vld [vmem:[#allocation8 + $0x30] sm:$0xff]  ;;  %p2814_p1 = scmp.ne.s32.totalorder %s3503_s10, %s2813_s14  ;;  %s2903_s22 = smov [#allocation10]  }
  0x9c   : > { %v317_v24 = vld [vmem:[#allocation7 + $0x48] sm:$0xff]  ;;  %v3218_v25 = vpack.c.bf16 %v329_v21, %v328_v20  ;;  %v331_v27 = vld [vmem:[#allocation8 + $0x38] sm:$0xff]  ;;  %v318_v29 = vld [vmem:[#allocation7 + $0x50] sm:$0xff]  ;;  %s2817_s17 = sshll.u32 %s2903_s22, 4  ;;  %s2818_s17 = int_to_ptr.vmem [resolvable:$false] %s2817_s17 }
  0x9d   : > { %2269 = vmatpush3.bf16.msra.mxu0 %v3193_v7  ;;  %2290 = vmatpush3.bf16.msra.mxu1 %v3206_v16  ;;  %v3222_v28 = vpack.c.bf16 %v317_v24, %v316_v23  ;;  %v319_v30 = vld [vmem:[#allocation7 + $0x58] sm:$0xff]  ;;  %v3226_v31 = vpack.c.bf16 %v331_v27, %v330_v26  ;;  %v332_v32 = vld [vmem:[#allocation8 + $0x40] sm:$0xff]  ;;  %v333_v33 = vld [vmem:[#allocation8 + $0x48] sm:$0xff]  ;;  %p2815_p6 = pnand %p2814_p1, %p3584_p13  ;;  %s2819_s3 = scalar_lea.vmem %s2818_s17, 2048 }
  0x9e   : > { %2270 = vmatprep.subr.bf16.mxu0 %v2900_v0  ;;  %2291 = vmatprep.subr.bf16.mxu1 %v2900_v0  ;;  %v3230_v34 = vpack.c.bf16 %v319_v30, %v318_v29  ;;  %v320_v35 = vld [vmem:[#allocation7 + $0x60] sm:$0xff]  ;;  %v321_v36 = vld [vmem:[#allocation7 + $0x68] sm:$0xff]  ;;  %v3234_v37 = vpack.c.bf16 %v333_v33, %v332_v32  ;;  %v322_v39 = vld [vmem:[#allocation7 + $0x70] sm:$0xff]  ;;  %p2820_p4 = scmp.lt.s32.totalorder %s3503_s10, %s2818_s17  ;;  %p2821_p5 = scmp.lt.s32.totalorder %s2819_s3, %s2813_s14 }
  0x9f   : > { %v3238_v38 = vpack.c.bf16 %v321_v36, %v320_v35  ;;  %v323_v40 = vld [vmem:[#allocation7 + $0x78] sm:$0xff]  ;;  %v334_v42 = vld [vmem:[#allocation8 + $0x50] sm:$0xff]  ;;  %v336_v45 = vld [vmem:[#allocation8 + $0x60] sm:$0xff]  ;;  %p2816_p10 = pneg %p2815_p6 }
  0xa0   : > { %v3244_v41 = vpack.c.bf16 %v323_v40, %v322_v39  ;;  %v335_v43 = vld [vmem:[#allocation8 + $0x58] sm:$0xff]  ;;  %v337_v46 = vld [vmem:[#allocation8 + $0x68] sm:$0xff]  ;;  %v338_v48 = vld [vmem:[#allocation8 + $0x70] sm:$0xff]  ;;  %p2822_p3 = por %p2821_p5, %p2820_p4 }
  0xa1   : > { %2272 = vmatpush3.bf16.msra.mxu0 %v3204_v15  ;;  %2293 = vmatpush3.bf16.msra.mxu1 %v3210_v19  ;;  %v3268_v44 = vpack.c.bf16 %v335_v43, %v334_v42  ;;  %v3272_v47 = vpack.c.bf16 %v337_v46, %v336_v45  ;;  %v339_v49 = vld [vmem:[#allocation8 + $0x78] sm:$0xff]  ;;  %v349_v51 = vld [vmem:[%s3169_s13] sm:$0xff]  ;;  %v3302_v56 = vld [vmem:[%s3558_s4] ss:$0 sm:$0xff] }
  0xa2   : > { %2273 = vmatprep.subr.bf16.mxu0 %v2900_v0  ;;  %2294 = vmatprep.subr.bf16.mxu1 %v2900_v0  ;;  %v3275_v50 = vpack.c.bf16 %v339_v49, %v338_v48  ;;  %v1520_v61 = vld [vmem:[%s3169_s13 + $0x8] sm:$0xff]  ;;  %v1524_v23 = vld [vmem:[%s3169_s13 + $0x18] sm:$0xff]  ;;  %v1526_v36 = vld [vmem:[%s3169_s13 + $0x20] sm:$0xff]  ;;  %p2823_p7 = pnand %p2822_p3, %p2816_p10 }
  0xa5   : > { %2275 = vmatpush3.bf16.msra.mxu0 %v3214_v22  ;;  %2296 = vmatpush3.bf16.msra.mxu1 %v3218_v25 }
  0xa6   : > { %2276 = vmatprep.subr.bf16.mxu0 %v2900_v0  ;;  %2297 = vmatprep.subr.bf16.mxu1 %v2900_v0 }
  0xa9   : > { %2278 = vmatpush3.bf16.msra.mxu0 %v3222_v28  ;;  %2299 = vmatpush3.bf16.msra.mxu1 %v3226_v31 }
  0xaa   : > { %2279 = vmatprep.subr.bf16.mxu0 %v2900_v0  ;;  %2300 = vmatprep.subr.bf16.mxu1 %v2900_v0 }
  0xad   : > { %2281 = vmatpush3.bf16.msra.mxu0 %v3230_v34  ;;  %2302 = vmatpush3.bf16.msra.mxu1 %v3234_v37 }
  0xae   : > { %2282 = vmatprep.subr.bf16.mxu0 %v2900_v0  ;;  %2303 = vmatprep.subr.bf16.mxu1 %v2900_v0 }
  0xb1   : > { %2284 = vmatpush3.bf16.msra.mxu0 %v3238_v38  ;;  %2305 = vmatpush3.bf16.msra.mxu1 %v3268_v44 }
  0xb2   : > { %2285 = vmatprep.subr.bf16.mxu0 %v2900_v0  ;;  %2306 = vmatprep.subr.bf16.mxu1 %v2900_v0 }
  0xb5   : > { %2287 = vmatpush3.bf16.msra.mxu0 %v3244_v41  ;;  %2308 = vmatpush3.bf16.msra.mxu1 %v3272_v47 }
  0xb6   : > { %2312 = vmatprep.subr.bf16.mxu0 %v2900_v0  ;;  %2309 = vmatprep.subr.bf16.mxu1 %v2900_v0 }
  0xb8   : > { %1807 = vmatmul.mubr.f32.vlgmr.msra.gmra.mrb[0].mxu0 %v3197_v10 }
  0xb9   : > { %2314 = vmatpush3.bf16.msra.mxu0 %v3189_v5  ;;  %1876 = vmatprep.mubr.msk.f32.mxu0 %vm2901_vm0, %v2902_v1 }
  0xba   : > { %2315 = vmatprep.subr.bf16.mxu0 %v2900_v0  ;;  %2311 = vmatpush3.bf16.msra.mxu1 %v3275_v50 }
  0xbb   : > { %2336 = vmatprep.subr.bf16.mxu1 %v2900_v0 }
  0xbd   : > { %2317 = vmatpush3.bf16.msra.mxu0 %v3193_v7 }
  0xbe   : > { %2318 = vmatprep.subr.bf16.mxu0 %v2900_v0 }
  0xc1   : > { %2320 = vmatpush3.bf16.msra.mxu0 %v3204_v15 }
  0xc2   : > { %2321 = vmatprep.subr.bf16.mxu0 %v2900_v0 }
  0xc5   : > { %2323 = vmatpush3.bf16.msra.mxu0 %v3214_v22 }
  0xc6   : > { %2324 = vmatprep.subr.bf16.mxu0 %v2900_v0 }
  0xc9   : > { %2326 = vmatpush3.bf16.msra.mxu0 %v3222_v28 }
  0xca   : > { %2327 = vmatprep.subr.bf16.mxu0 %v2900_v0 }
  0xcd   : > { %2329 = vmatpush3.bf16.msra.mxu0 %v3230_v34 }
  0xce   : > { %2330 = vmatprep.subr.bf16.mxu0 %v2900_v0 }
  0xd1   : > { %2332 = vmatpush3.bf16.msra.mxu0 %v3238_v38 }
  0xd2   : > { %2333 = vmatprep.subr.bf16.mxu0 %v2900_v0 }
  0xd5   : > { %2335 = vmatpush3.bf16.msra.mxu0 %v3244_v41 }
  0xd6   : > { %2360 = vmatprep.subr.bf16.mxu0 %v2900_v0 }
 0x18b   : > { %v416_v52 = vpop.f32.mrb[0].mxu0 }
 0x18c   : > { %v417_v53 = vadd.f32 %v416_v52, %v349_v51  ;;  %v1808_v54 = vpop.f32.mrb[1].mxu0 }
 0x18e   : > { %2683 = vtanh.f32 %v417_v53 }
 0x198   : > { %v2684_v55 = vpop.eup %2683 }
 0x199   : > { %1842 = vmatmul.mubr.f32.vlgmr.msra.gmra.mrb[0].mxu1 %v2684_v55 }
 0x19a   : > { %2338 = vmatpush3.bf16.msra.mxu1 %v3206_v16  ;;  %1911 = vmatprep.mubr.msk.f32.mxu1 %vm2901_vm0, %v2902_v1 }
 0x19b   : > { %2339 = vmatprep.subr.bf16.mxu1 %v2900_v0 }
 0x19e   : > { %2341 = vmatpush3.bf16.msra.mxu1 %v3210_v19 }
 0x19f   : > { %2342 = vmatprep.subr.bf16.mxu1 %v2900_v0 }
 0x1a2   : > { %2344 = vmatpush3.bf16.msra.mxu1 %v3218_v25 }
 0x1a3   : > { %2345 = vmatprep.subr.bf16.mxu1 %v2900_v0 }
 0x1a6   : > { %2347 = vmatpush3.bf16.msra.mxu1 %v3226_v31 }
 0x1a7   : > { %2348 = vmatprep.subr.bf16.mxu1 %v2900_v0 }
 0x1aa   : > { %2350 = vmatpush3.bf16.msra.mxu1 %v3234_v37 }
 0x1ab   : > { %2351 = vmatprep.subr.bf16.mxu1 %v2900_v0 }
 0x1ae   : > { %2353 = vmatpush3.bf16.msra.mxu1 %v3268_v44 }
 0x1af   : > { %2354 = vmatprep.subr.bf16.mxu1 %v2900_v0 }
 0x1b2   : > { %2356 = vmatpush3.bf16.msra.mxu1 %v3272_v47 }
 0x1b3   : > { %2357 = vmatprep.subr.bf16.mxu1 %v2900_v0 }
 0x1b6   : > { %2359 = vmatpush3.bf16.msra.mxu1 %v3275_v50 }
 0x1b7   : > { %2384 = vmatprep.subr.bf16.mxu1 %v2900_v0 }
 0x26c   : > { %v487_v57 = vpop.f32.mrb[0].mxu1 }
 0x26d   : > { %v491_v58 = vadd.f32 %v487_v57, %v3197_v10  ;;  %v1843_v59 = vpop.f32.mrb[1].mxu1  ;;  %v1522_v10 = vld [vmem:[%s3169_s13 + $0x10] sm:$0xff] }
 0x26f   : > { %v492_v60 = vadd.f32 %v3302_v56, %v491_v58 }
 0x271   : > { %1519 = vst [vmem:[%s3199_s6 + $0x8] sm:$0xff] %v492_v60  ;;  %1877 = vmatmul.mubr.f32.vlgmr.msra.gmra.mrb[2].mxu0 %v492_v60 }
 0x272   : > { %2362 = vmatpush3.bf16.msra.mxu0 %v3189_v5  ;;  %1946 = vmatprep.mubr.msk.f32.mxu0 %vm2901_vm0, %v2902_v1 }
 0x273   : > { %2363 = vmatprep.subr.bf16.mxu0 %v2900_v0 }
 0x276   : > { %2365 = vmatpush3.bf16.msra.mxu0 %v3193_v7 }
 0x277   : > { %2366 = vmatprep.subr.bf16.mxu0 %v2900_v0 }
 0x27a   : > { %2368 = vmatpush3.bf16.msra.mxu0 %v3204_v15 }
 0x27b   : > { %2369 = vmatprep.subr.bf16.mxu0 %v2900_v0 }
 0x27e   : > { %2371 = vmatpush3.bf16.msra.mxu0 %v3214_v22 }
 0x27f   : > { %2372 = vmatprep.subr.bf16.mxu0 %v2900_v0 }
 0x282   : > { %2374 = vmatpush3.bf16.msra.mxu0 %v3222_v28 }
 0x283   : > { %2375 = vmatprep.subr.bf16.mxu0 %v2900_v0 }
 0x286   : > { %2377 = vmatpush3.bf16.msra.mxu0 %v3230_v34 }
 0x287   : > { %2378 = vmatprep.subr.bf16.mxu0 %v2900_v0 }
 0x28a   : > { %2380 = vmatpush3.bf16.msra.mxu0 %v3238_v38 }
 0x28b   : > { %2381 = vmatprep.subr.bf16.mxu0 %v2900_v0 }
 0x28e   : > { %2383 = vmatpush3.bf16.msra.mxu0 %v3244_v41 }
 0x28f   : > { %2408 = vmatprep.subr.bf16.mxu0 %v2900_v0 }
 0x344   : > { %v563_v62 = vpop.f32.mrb[2].mxu0 }
 0x345   : > { %v564_v63 = vadd.f32 %v1520_v61, %v563_v62  ;;  %v1878_v2 = vpop.f32.mrb[3].mxu0 }
 0x347   : > { %2685 = vtanh.f32 %v564_v63 }
 0x351   : > { %v2686_v3 = vpop.eup %2685 }
 0x352   : > { %1912 = vmatmul.mubr.f32.vlgmr.msra.gmra.mrb[2].mxu1 %v2686_v3 }
 0x353   : > { %2386 = vmatpush3.bf16.msra.mxu1 %v3206_v16  ;;  %1981 = vmatprep.mubr.msk.f32.mxu1 %vm2901_vm0, %v2902_v1 }
 0x354   : > { %2387 = vmatprep.subr.bf16.mxu1 %v2900_v0 }
 0x357   : > { %2389 = vmatpush3.bf16.msra.mxu1 %v3210_v19 }
 0x358   : > { %2390 = vmatprep.subr.bf16.mxu1 %v2900_v0 }
 0x35b   : > { %2392 = vmatpush3.bf16.msra.mxu1 %v3218_v25 }
 0x35c   : > { %2393 = vmatprep.subr.bf16.mxu1 %v2900_v0 }
 0x35f   : > { %2395 = vmatpush3.bf16.msra.mxu1 %v3226_v31 }
 0x360   : > { %2396 = vmatprep.subr.bf16.mxu1 %v2900_v0 }
 0x363   : > { %2398 = vmatpush3.bf16.msra.mxu1 %v3234_v37 }
 0x364   : > { %2399 = vmatprep.subr.bf16.mxu1 %v2900_v0 }
 0x367   : > { %2401 = vmatpush3.bf16.msra.mxu1 %v3268_v44 }
 0x368   : > { %2402 = vmatprep.subr.bf16.mxu1 %v2900_v0 }
 0x36b   : > { %2404 = vmatpush3.bf16.msra.mxu1 %v3272_v47 }
 0x36c   : > { %2405 = vmatprep.subr.bf16.mxu1 %v2900_v0 }
 0x36f   : > { %2407 = vmatpush3.bf16.msra.mxu1 %v3275_v50 }
 0x370   : > { %2432 = vmatprep.subr.bf16.mxu1 %v2900_v0 }
 0x425   : > { %v634_v4 = vpop.f32.mrb[2].mxu1 }
 0x426   : > { %v638_v6 = vadd.f32 %v634_v4, %v492_v60  ;;  %v1913_v8 = vpop.f32.mrb[3].mxu1 }
 0x428   : > { %v639_v9 = vadd.f32 %v3302_v56, %v638_v6 }
 0x42a   : > { %1521 = vst [vmem:[%s3199_s6 + $0x10] sm:$0xff] %v639_v9  ;;  %1947 = vmatmul.mubr.f32.vlgmr.msra.gmra.mrb[4].mxu0 %v639_v9 }
 0x42b   : > { %2410 = vmatpush3.bf16.msra.mxu0 %v3189_v5  ;;  %2016 = vmatprep.mubr.msk.f32.mxu0 %vm2901_vm0, %v2902_v1 }
 0x42c   : > { %2411 = vmatprep.subr.bf16.mxu0 %v2900_v0 }
 0x42f   : > { %2413 = vmatpush3.bf16.msra.mxu0 %v3193_v7 }
 0x430   : > { %2414 = vmatprep.subr.bf16.mxu0 %v2900_v0 }
 0x433   : > { %2416 = vmatpush3.bf16.msra.mxu0 %v3204_v15 }
 0x434   : > { %2417 = vmatprep.subr.bf16.mxu0 %v2900_v0 }
 0x437   : > { %2419 = vmatpush3.bf16.msra.mxu0 %v3214_v22 }
 0x438   : > { %2420 = vmatprep.subr.bf16.mxu0 %v2900_v0 }
 0x43b   : > { %2422 = vmatpush3.bf16.msra.mxu0 %v3222_v28 }
 0x43c   : > { %2423 = vmatprep.subr.bf16.mxu0 %v2900_v0 }
 0x43f   : > { %2425 = vmatpush3.bf16.msra.mxu0 %v3230_v34 }
 0x440   : > { %2426 = vmatprep.subr.bf16.mxu0 %v2900_v0 }
 0x443   : > { %2428 = vmatpush3.bf16.msra.mxu0 %v3238_v38 }
 0x444   : > { %2429 = vmatprep.subr.bf16.mxu0 %v2900_v0 }
 0x447   : > { %2431 = vmatpush3.bf16.msra.mxu0 %v3244_v41 }
 0x448   : > { %2456 = vmatprep.subr.bf16.mxu0 %v2900_v0 }
 0x4fd   : > { %v710_v11 = vpop.f32.mrb[4].mxu0 }
 0x4fe   : > { %v711_v12 = vadd.f32 %v1522_v10, %v710_v11  ;;  %v1948_v13 = vpop.f32.mrb[5].mxu0 }
 0x500   : > { %2687 = vtanh.f32 %v711_v12 }
 0x50a   : > { %v2688_v14 = vpop.eup %2687 }
 0x50b   : > { %1982 = vmatmul.mubr.f32.vlgmr.msra.gmra.mrb[4].mxu1 %v2688_v14 }
 0x50c   : > { %2434 = vmatpush3.bf16.msra.mxu1 %v3206_v16  ;;  %2051 = vmatprep.mubr.msk.f32.mxu1 %vm2901_vm0, %v2902_v1 }
 0x50d   : > { %2435 = vmatprep.subr.bf16.mxu1 %v2900_v0 }
 0x510   : > { %2437 = vmatpush3.bf16.msra.mxu1 %v3210_v19 }
 0x511   : > { %2438 = vmatprep.subr.bf16.mxu1 %v2900_v0 }
 0x514   : > { %2440 = vmatpush3.bf16.msra.mxu1 %v3218_v25 }
 0x515   : > { %2441 = vmatprep.subr.bf16.mxu1 %v2900_v0 }
 0x518   : > { %2443 = vmatpush3.bf16.msra.mxu1 %v3226_v31 }
 0x519   : > { %2444 = vmatprep.subr.bf16.mxu1 %v2900_v0 }
 0x51c   : > { %2446 = vmatpush3.bf16.msra.mxu1 %v3234_v37 }
 0x51d   : > { %2447 = vmatprep.subr.bf16.mxu1 %v2900_v0 }
 0x520   : > { %2449 = vmatpush3.bf16.msra.mxu1 %v3268_v44 }
 0x521   : > { %2450 = vmatprep.subr.bf16.mxu1 %v2900_v0 }
 0x524   : > { %2452 = vmatpush3.bf16.msra.mxu1 %v3272_v47 }
 0x525   : > { %2453 = vmatprep.subr.bf16.mxu1 %v2900_v0 }
 0x528   : > { %2455 = vmatpush3.bf16.msra.mxu1 %v3275_v50 }
 0x529   : > { %2480 = vmatprep.subr.bf16.mxu1 %v2900_v0 }
 0x5de   : > { %v781_v17 = vpop.f32.mrb[4].mxu1 }
 0x5df   : > { %v785_v18 = vadd.f32 %v781_v17, %v639_v9  ;;  %v1983_v20 = vpop.f32.mrb[5].mxu1 }
 0x5e1   : > { %v786_v21 = vadd.f32 %v3302_v56, %v785_v18 }
 0x5e3   : > { %1523 = vst [vmem:[%s3199_s6 + $0x18] sm:$0xff] %v786_v21  ;;  %2017 = vmatmul.mubr.f32.vlgmr.msra.gmra.mrb[6].mxu0 %v786_v21 }
 0x5e4   : > { %2458 = vmatpush3.bf16.msra.mxu0 %v3189_v5  ;;  %2086 = vmatprep.mubr.msk.f32.mxu0 %vm2901_vm0, %v2902_v1 }
 0x5e5   : > { %2459 = vmatprep.subr.bf16.mxu0 %v2900_v0 }
 0x5e8   : > { %2461 = vmatpush3.bf16.msra.mxu0 %v3193_v7 }
 0x5e9   : > { %2462 = vmatprep.subr.bf16.mxu0 %v2900_v0 }
 0x5ec   : > { %2464 = vmatpush3.bf16.msra.mxu0 %v3204_v15 }
 0x5ed   : > { %2465 = vmatprep.subr.bf16.mxu0 %v2900_v0 }
 0x5f0   : > { %2467 = vmatpush3.bf16.msra.mxu0 %v3214_v22 }
 0x5f1   : > { %2468 = vmatprep.subr.bf16.mxu0 %v2900_v0 }
 0x5f4   : > { %2470 = vmatpush3.bf16.msra.mxu0 %v3222_v28 }
 0x5f5   : > { %2471 = vmatprep.subr.bf16.mxu0 %v2900_v0 }
 0x5f8   : > { %2473 = vmatpush3.bf16.msra.mxu0 %v3230_v34 }
 0x5f9   : > { %2474 = vmatprep.subr.bf16.mxu0 %v2900_v0 }
 0x5fc   : > { %2476 = vmatpush3.bf16.msra.mxu0 %v3238_v38 }
 0x5fd   : > { %2477 = vmatprep.subr.bf16.mxu0 %v2900_v0 }
 0x600   : > { %2479 = vmatpush3.bf16.msra.mxu0 %v3244_v41 }
 0x601   : > { %2504 = vmatprep.subr.bf16.mxu0 %v2900_v0 }
 0x6b6   : > { %v857_v24 = vpop.f32.mrb[6].mxu0 }
 0x6b7   : > { %v858_v26 = vadd.f32 %v1524_v23, %v857_v24  ;;  %v2018_v27 = vpop.f32.mrb[7].mxu0 }
 0x6b9   : > { %2689 = vtanh.f32 %v858_v26 }
 0x6c3   : > { %v2690_v29 = vpop.eup %2689 }
 0x6c4   : > { %2052 = vmatmul.mubr.f32.vlgmr.msra.gmra.mrb[6].mxu1 %v2690_v29 }
 0x6c5   : > { %2482 = vmatpush3.bf16.msra.mxu1 %v3206_v16  ;;  %2121 = vmatprep.mubr.msk.f32.mxu1 %vm2901_vm0, %v2902_v1 }
 0x6c6   : > { %2483 = vmatprep.subr.bf16.mxu1 %v2900_v0 }
 0x6c9   : > { %2485 = vmatpush3.bf16.msra.mxu1 %v3210_v19 }
 0x6ca   : > { %2486 = vmatprep.subr.bf16.mxu1 %v2900_v0 }
 0x6cd   : > { %2488 = vmatpush3.bf16.msra.mxu1 %v3218_v25 }
 0x6ce   : > { %2489 = vmatprep.subr.bf16.mxu1 %v2900_v0 }
 0x6d1   : > { %2491 = vmatpush3.bf16.msra.mxu1 %v3226_v31 }
 0x6d2   : > { %2492 = vmatprep.subr.bf16.mxu1 %v2900_v0 }
 0x6d5   : > { %2494 = vmatpush3.bf16.msra.mxu1 %v3234_v37 }
 0x6d6   : > { %2495 = vmatprep.subr.bf16.mxu1 %v2900_v0 }
 0x6d9   : > { %2497 = vmatpush3.bf16.msra.mxu1 %v3268_v44 }
 0x6da   : > { %2498 = vmatprep.subr.bf16.mxu1 %v2900_v0 }
 0x6dd   : > { %2500 = vmatpush3.bf16.msra.mxu1 %v3272_v47 }
 0x6de   : > { %2501 = vmatprep.subr.bf16.mxu1 %v2900_v0 }
 0x6e1   : > { %2503 = vmatpush3.bf16.msra.mxu1 %v3275_v50 }
 0x6e2   : > { %2528 = vmatprep.subr.bf16.mxu1 %v2900_v0 }
 0x797   : > { %v928_v30 = vpop.f32.mrb[6].mxu1 }
 0x798   : > { %v932_v32 = vadd.f32 %v928_v30, %v786_v21  ;;  %v2053_v33 = vpop.f32.mrb[7].mxu1 }
 0x79a   : > { %v933_v35 = vadd.f32 %v3302_v56, %v932_v32 }
 0x79c   : > { %1525 = vst [vmem:[%s3199_s6 + $0x20] sm:$0xff] %v933_v35  ;;  %2087 = vmatmul.mubr.f32.vlgmr.msra.gmra.mrb[8].mxu0 %v933_v35 }
 0x79d   : > { %2506 = vmatpush3.bf16.msra.mxu0 %v3189_v5  ;;  %2156 = vmatprep.mubr.msk.f32.mxu0 %vm2901_vm0, %v2902_v1 }
 0x79e   : > { %2507 = vmatprep.subr.bf16.mxu0 %v2900_v0 }
 0x7a1   : > { %2509 = vmatpush3.bf16.msra.mxu0 %v3193_v7 }
 0x7a2   : > { %2510 = vmatprep.subr.bf16.mxu0 %v2900_v0 }
 0x7a5   : > { %2512 = vmatpush3.bf16.msra.mxu0 %v3204_v15 }
 0x7a6   : > { %2513 = vmatprep.subr.bf16.mxu0 %v2900_v0 }
 0x7a9   : > { %2515 = vmatpush3.bf16.msra.mxu0 %v3214_v22 }
 0x7aa   : > { %2516 = vmatprep.subr.bf16.mxu0 %v2900_v0 }
 0x7ad   : > { %2518 = vmatpush3.bf16.msra.mxu0 %v3222_v28 }
 0x7ae   : > { %2519 = vmatprep.subr.bf16.mxu0 %v2900_v0 }
 0x7b1   : > { %2521 = vmatpush3.bf16.msra.mxu0 %v3230_v34 }
 0x7b2   : > { %2522 = vmatprep.subr.bf16.mxu0 %v2900_v0 }
 0x7b5   : > { %2524 = vmatpush3.bf16.msra.mxu0 %v3238_v38 }
 0x7b6   : > { %2525 = vmatprep.subr.bf16.mxu0 %v2900_v0 }
 0x7b9   : > { %2527 = vmatpush3.bf16.msra.mxu0 %v3244_v41 }
 0x7ba   : > { %2552 = vmatprep.subr.bf16.mxu0 %v2900_v0 }
 0x86f   : > { %v1004_v39 = vpop.f32.mrb[8].mxu0 }
 0x870   : > { %v1005_v40 = vadd.f32 %v1526_v36, %v1004_v39  ;;  %v2088_v42 = vpop.f32.mrb[9].mxu0 }
 0x872   : > { %2691 = vtanh.f32 %v1005_v40 }
 0x87c   : > { %v2692_v43 = vpop.eup %2691 }
 0x87d   : > { %2122 = vmatmul.mubr.f32.vlgmr.msra.gmra.mrb[8].mxu1 %v2692_v43 }
 0x87e   : > { %2530 = vmatpush3.bf16.msra.mxu1 %v3206_v16  ;;  %2191 = vmatprep.mubr.msk.f32.mxu1 %vm2901_vm0, %v2902_v1 }
 0x87f   : > { %2531 = vmatprep.subr.bf16.mxu1 %v2900_v0 }
 0x882   : > { %2533 = vmatpush3.bf16.msra.mxu1 %v3210_v19 }
 0x883   : > { %2534 = vmatprep.subr.bf16.mxu1 %v2900_v0 }
 0x886   : > { %2536 = vmatpush3.bf16.msra.mxu1 %v3218_v25 }
 0x887   : > { %2537 = vmatprep.subr.bf16.mxu1 %v2900_v0 }
 0x88a   : > { %2539 = vmatpush3.bf16.msra.mxu1 %v3226_v31 }
 0x88b   : > { %2540 = vmatprep.subr.bf16.mxu1 %v2900_v0 }
 0x88e   : > { %2542 = vmatpush3.bf16.msra.mxu1 %v3234_v37 }
 0x88f   : > { %2543 = vmatprep.subr.bf16.mxu1 %v2900_v0 }
 0x892   : > { %2545 = vmatpush3.bf16.msra.mxu1 %v3268_v44 }
 0x893   : > { %2546 = vmatprep.subr.bf16.mxu1 %v2900_v0 }
 0x896   : > { %2548 = vmatpush3.bf16.msra.mxu1 %v3272_v47 }
 0x897   : > { %2549 = vmatprep.subr.bf16.mxu1 %v2900_v0 }
 0x89a   : > { %2551 = vmatpush3.bf16.msra.mxu1 %v3275_v50 }
 0x89b   : > { %2576 = vmatprep.subr.bf16.mxu1 %v2900_v0 }
 0x950   : > { %v1075_v45 = vpop.f32.mrb[8].mxu1 }
 0x951   : > { %v1079_v46 = vadd.f32 %v1075_v45, %v933_v35  ;;  %v2123_v48 = vpop.f32.mrb[9].mxu1 }
 0x953   : > { %v1080_v49 = vadd.f32 %v3302_v56, %v1079_v46 }
 0x955   : > { %1527 = vst [vmem:[%s3199_s6 + $0x28] sm:$0xff] %v1080_v49  ;;  %2157 = vmatmul.mubr.f32.vlgmr.msra.gmra.mrb[10].mxu0 %v1080_v49 }
 0x956   : > { %2554 = vmatpush3.bf16.msra.mxu0 %v3189_v5  ;;  %2226 = vmatprep.mubr.msk.f32.mxu0 %vm2901_vm0, %v2902_v1  ;;  %v1528_v5 = vld [vmem:[%s3169_s13 + $0x28] sm:$0xff] }
 0x957   : > { %2555 = vmatprep.subr.bf16.mxu0 %v2900_v0 }
 0x95a   : > { %2557 = vmatpush3.bf16.msra.mxu0 %v3193_v7 }
 0x95b   : > { %2558 = vmatprep.subr.bf16.mxu0 %v2900_v0 }
 0x95e   : > { %2560 = vmatpush3.bf16.msra.mxu0 %v3204_v15 }
 0x95f   : > { %2561 = vmatprep.subr.bf16.mxu0 %v2900_v0 }
 0x962   : > { %2563 = vmatpush3.bf16.msra.mxu0 %v3214_v22 }
 0x963   : > { %2564 = vmatprep.subr.bf16.mxu0 %v2900_v0 }
 0x966   : > { %2566 = vmatpush3.bf16.msra.mxu0 %v3222_v28  ;;  %v1530_v28 = vld [vmem:[%s3169_s13 + $0x30] sm:$0xff] }
 0x967   : > { %2567 = vmatprep.subr.bf16.mxu0 %v2900_v0 }
 0x96a   : > { %2569 = vmatpush3.bf16.msra.mxu0 %v3230_v34 }
 0x96b   : > { %2570 = vmatprep.subr.bf16.mxu0 %v2900_v0 }
 0x96e   : > { %2572 = vmatpush3.bf16.msra.mxu0 %v3238_v38 }
 0x96f   : > { %2573 = vmatprep.subr.bf16.mxu0 %v2900_v0 }
 0x972   : > { %2575 = vmatpush3.bf16.msra.mxu0 %v3244_v41 }
 0xa28   : > { %v1151_v7 = vpop.f32.mrb[10].mxu0 }
 0xa29   : > { %v1152_v15 = vadd.f32 %v1528_v5, %v1151_v7  ;;  %v2158_v22 = vpop.f32.mrb[11].mxu0 }
 0xa2b   : > { %2693 = vtanh.f32 %v1152_v15 }
 0xa35   : > { %v2694_v51 = vpop.eup %2693 }
 0xa36   : > { %2192 = vmatmul.mubr.f32.vlgmr.msra.gmra.mrb[10].mxu1 %v2694_v51 }
 0xa37   : > { %2578 = vmatpush3.bf16.msra.mxu1 %v3206_v16  ;;  %2261 = vmatprep.mubr.msk.f32.mxu1 %vm2901_vm0, %v2902_v1 }
 0xa38   : > { %2579 = vmatprep.subr.bf16.mxu1 %v2900_v0 }
 0xa3b   : > { %2581 = vmatpush3.bf16.msra.mxu1 %v3210_v19 }
 0xa3c   : > { %2582 = vmatprep.subr.bf16.mxu1 %v2900_v0 }
 0xa3f   : > { %2584 = vmatpush3.bf16.msra.mxu1 %v3218_v25 }
 0xa40   : > { %2585 = vmatprep.subr.bf16.mxu1 %v2900_v0 }
 0xa43   : > { %2587 = vmatpush3.bf16.msra.mxu1 %v3226_v31 }
 0xa44   : > { %2588 = vmatprep.subr.bf16.mxu1 %v2900_v0 }
 0xa47   : > { %2590 = vmatpush3.bf16.msra.mxu1 %v3234_v37 }
 0xa48   : > { %2591 = vmatprep.subr.bf16.mxu1 %v2900_v0 }
 0xa4b   : > { %2593 = vmatpush3.bf16.msra.mxu1 %v3268_v44 }
 0xa4c   : > { %2594 = vmatprep.subr.bf16.mxu1 %v2900_v0 }
 0xa4f   : > { %2596 = vmatpush3.bf16.msra.mxu1 %v3272_v47 }
 0xa50   : > { %2597 = vmatprep.subr.bf16.mxu1 %v2900_v0 }
 0xa53   : > { %2599 = vmatpush3.bf16.msra.mxu1 %v3275_v50 }
 0xb09   : > { %v1222_v1 = vpop.f32.mrb[10].mxu1 }
 0xb0a   : > { %v1226_v16 = vadd.f32 %v1222_v1, %v1080_v49  ;;  %v2193_v19 = vpop.f32.mrb[11].mxu1 }
 0xb0c   : > { %v1227_v25 = vadd.f32 %v3302_v56, %v1226_v16 }
 0xb0e   : > { %1529 = vst [vmem:[%s3199_s6 + $0x30] sm:$0xff] %v1227_v25  ;;  %2227 = vmatmul.mubr.f32.vlgmr.msra.gmra.mrb[12].mxu0 %v1227_v25 }
 0xbe1   : > { %v1298_v31 = vpop.f32.mrb[12].mxu0 }
 0xbe2   : > { %v1299_v34 = vadd.f32 %v1530_v28, %v1298_v31  ;;  %v2228_v37 = vpop.f32.mrb[13].mxu0 }
 0xbe4   : > { %2695 = vtanh.f32 %v1299_v34 }
 0xbee   : > { %v2696_v38 = vpop.eup %2695 }
 0xbef   : > { %2262 = vmatmul.mubr.f32.vlgmr.msra.gmra.mrb[12].mxu1 %v2696_v38 }
 0xcc2   : > { %v1369_v0 = vpop.f32.mrb[12].mxu1 }
 0xcc3   : > { %v1373_v41 = vadd.f32 %v1369_v0, %v1227_v25  ;;  %v2263_v44 = vpop.f32.mrb[13].mxu1 }
 0xcc5   : > { %v1374_v47 = vadd.f32 %v3302_v56, %v1373_v41 }
 0xcc7   : > { %1531 = vst [vmem:[%s3199_s6 + $0x38] sm:$0xff] %v1374_v47 }
 0xcc8   : > { %2826 = shalt.err (!%p2823_p7)
}
 0xcc9   : > { %s2827_s26 = scalar_lea.hbm %s3508_s16, 1024  ;;  %s2831_s13 = scalar_lea.hbm %s3559_s5, 2048 }
 0xcca   : > { %p2828_p9 = scmp.ne.s32.totalorder %s3508_s16, %s2827_s26  ;;  %p2832_p11 = scmp.lt.u32.totalorder %s3508_s16, %s3559_s5 }
 0xccb   : > { %p2833_p2 = scmp.lt.u32.totalorder %s2831_s13, %s2827_s26  ;;  %p2835_p1 = scmp.lt.u32.totalorder %s2827_s26, %s3508_s16 }
 0xccc   : > { %p2829_p0 = pnand %p2828_p9, %p3584_p13 }
 0xccd   : > { %p2834_p12 = por %p2833_p2, %p2832_p11 }
 0xcce   : > { %p2830_p8 = pneg %p2829_p0 }
 0xccf   : > { %p2836_p6 = por %p2835_p1, %p2834_p12 }
 0xcd1   : > { %p2837_p10 = pnand %p2836_p6, %p2830_p8 }
 0xcd3   : > { %2840 = shalt.err (!%p2837_p10)
}
 0xcd4   : > { %s2904_s15 = smov 128   ;;  %s2905_s30 = smov 256  }
 0xcd5   : > { %s2906_s28 = smov 8  }
 0xcd6   : > { %2614 = dma.vmem_to_hbm [thread:$0]  (%p3584_p13), %s3503_s10, 1024, %s3508_s16, %s1378_s11, %s2904_s15, %s2905_s30, %s2906_s28  }
 0xcd7 PF: > { %s1405_s9 = sand.u32 1, %s2879_s18   ;;  %p3585_p4 = scmp.ne.s32.totalorder %s3568_s25, 0 }
 0xcd8   : > { %p3586_p5 = scmp.ge.s32.totalorder %s2891_s21, 2  ;;  %s1406_s2 = scalar_lea.sflag [#allocation4], %s1405_s9 }
 0xcda   : > { %p2631_p3 = pnand %p3586_p5, %p3585_p4 }
 0xcdc   : > { %2874 = dma.done.wait (!%p2631_p3), %s1406_s2, 1024  }
 0xcdd   : > { %2876 = vsyncadd (!%p2631_p3), %s1406_s2, 4294966272  ;;  %p22_p7 = scmp.ge.s32.totalorder %s3053_s29, 4   ;;  %s3587_s18 = smov %s2883_s19 }
 0xcde   : > { %s3588_s19 = smov %s2887_s20  ;;  %s3589_s20 = smov %s3069_s27 }
 0xcdf   : > { %s3590_s21 = smov %s3053_s29  ;;  %24 = sbr.rel (!%p22_p7) target bundleno = 11 (0xb), region = 119 }
 0xce6   :  { %1411 = vsyncpa [#allocation3], 1 }
 0xce7   :  { %1413 = vsyncpa [#allocation3 + $0x1], 1 }
 0xce8   :  { %1414 = vsyncpa [#allocation6], 1 }
 0xce9   :  { %1416 = vsyncpa [#allocation6 + $0x1], 1 }
 0xcea   :  { %1417 = vsyncpa [#allocation9], 1 }
 0xceb   :  { %1418 = vsyncpa [#allocation4], 1 }
 0xcec   :  { %1420 = vsyncpa [#allocation4 + $0x1], 1 }

</bundles_post_ra>
